<compile_context>
chip_gen: v7x
topology: tpu7x:2x2x1
jax: 0.10.0
libtpu: 0.0.40
codegen_flags: <defaults>
</compile_context>

<pallas_src>
import functools
import math

import jax
import jax.numpy as jnp
from jax.experimental import pallas as pl
from jax.experimental.pallas import tpu as pltpu

EPS_BN = 1e-5


def _vmem():
    # whole-array block resident in VMEM (shapes here are small)
    return pl.BlockSpec(memory_space=pltpu.MemorySpace.VMEM)


def _rup(x, m=128):
    return -(-x // m) * m


def _pad_last(a, cols):
    pad = [(0, 0)] * (a.ndim - 1) + [(0, cols - a.shape[-1])]
    return jnp.pad(a, pad)


def _pad2(a, rows, cols):
    return jnp.pad(a, ((0, rows - a.shape[0]), (0, cols - a.shape[1])))


def _padded_vmem_bytes(shape, dtype):
    """(sublane, 128)-padded VMEM footprint; sublane tile is dtype-dependent."""
    itemsize = jnp.dtype(dtype).itemsize
    sub_tile = {4: 8, 2: 16, 1: 32}.get(itemsize, 8)
    shape = tuple(shape)
    if len(shape) == 0:
        shape = (1, 1)
    elif len(shape) == 1:
        shape = (1,) + shape
    lead = math.prod(shape[:-2]) if len(shape) > 2 else 1
    sub = -(-shape[-2] // sub_tile) * sub_tile
    lane = -(-shape[-1] // 128) * 128
    return lead * sub * lane * itemsize


# --------------------------------------------------------------------------
# Single fused kernel: num_layer x (GIN conv + MLP + BN [+ReLU]) -> pooling
# -> fused expert/gate head -> gate BN/ReLU/Linear -> student-t assignment.
# --------------------------------------------------------------------------
def fused_forward_kernel(h0_ref, adj_ref, eagg_ref,
                         w1_ref, b1_ref, w2_ref, b2_ref, gamma_ref, beta_ref,
                         psum_ref, invcnt_ref,
                         headw_ref, eb_ref,
                         gb1_ref, ggamma_ref, gbeta_ref,
                         gw2_ref, gb2_ref,
                         clusterT_ref, csq_ref,
                         out_ref, *, num_layer, num_experts):
    dp = h0_ref.shape[-1]            # padded feature width (multiple of 128)
    clf_w = eb_ref.shape[-1]         # padded expert-head width
    n_nodes = h0_ref.shape[0]
    inv_n = 1.0 / n_nodes

    h = h0_ref[...]                  # [N, DP] f32
    adj = adj_ref[...]               # [N, N]  bf16 (exact edge counts)

    # ---- GIN layers (statically unrolled; h stays resident in vregs/VMEM) ----
    for l in range(num_layer):
        # aggregation: adjacency matmul + pre-aggregated edge embeddings
        aggr = jnp.dot(adj, h.astype(jnp.bfloat16),
                       preferred_element_type=jnp.float32) + eagg_ref[l]
        # GIN MLP: Linear -> ReLU -> Linear (bf16 MXU, f32 accumulate)
        h1 = jnp.dot(aggr.astype(jnp.bfloat16), w1_ref[l],
                     preferred_element_type=jnp.float32) + b1_ref[l]
        h1 = jnp.maximum(h1, 0.0)
        h2 = jnp.dot(h1.astype(jnp.bfloat16), w2_ref[l],
                     preferred_element_type=jnp.float32) + b2_ref[l]
        # BatchNorm1d (batch statistics) — single-pass sum / sum-of-squares
        stats = jnp.sum(jnp.concatenate([h2, h2 * h2], axis=1),
                        axis=0, keepdims=True) * inv_n          # [1, 2*DP]
        mu = stats[:, :dp]
        var = jnp.maximum(stats[:, dp:] - mu * mu, 0.0)
        h = (h2 - mu) * jax.lax.rsqrt(var + EPS_BN) * gamma_ref[l] + beta_ref[l]
        if l != num_layer - 1:        # JK='last': no ReLU on last layer
            h = jnp.maximum(h, 0.0)

    # ---- pooling: one add-pool matmul; mean pool = add pool * 1/count ----
    gate_in = jnp.dot(psum_ref[...], h.astype(jnp.bfloat16),
                      preferred_element_type=jnp.float32)       # [B, DP]

    # ---- fused head matmul: gate_in @ [experts_w | gate_w1] ----
    head = jnp.dot(gate_in.astype(jnp.bfloat16), headw_ref[...],
                   preferred_element_type=jnp.float32)          # [B, CLF_W+GP]
    # expert logits use mean pooling: rescale the expert slice by 1/count
    clf_blk = head[:, :clf_w] * invcnt_ref[...] + eb_ref[...]   # [B, CLF_W]

    # ---- gate MLP: (Linear done above) -> BatchNorm1d -> ReLU -> Linear ----
    g = head[:, clf_w:] + gb1_ref[...]                          # [B, GP]
    gp = g.shape[-1]
    inv_b = 1.0 / g.shape[0]
    gstats = jnp.sum(jnp.concatenate([g, g * g], axis=1),
                     axis=0, keepdims=True) * inv_b
    gmu = gstats[:, :gp]
    gvar = jnp.maximum(gstats[:, gp:] - gmu * gmu, 0.0)
    g = (g - gmu) * jax.lax.rsqrt(gvar + EPS_BN) * ggamma_ref[...] + gbeta_ref[...]
    g = jnp.maximum(g, 0.0)
    z = jnp.dot(g.astype(jnp.bfloat16), gw2_ref[...],
                preferred_element_type=jnp.float32) + gb2_ref[...]   # [B, GP]

    # ---- student-t cluster assignment (q.pow(1.0) is identity) ----
    ct = clusterT_ref[...]                                      # [GP, QW] f32
    d2 = (jnp.sum(z * z, axis=1, keepdims=True) + csq_ref[...]
          - 2.0 * jnp.dot(z, ct, preferred_element_type=jnp.float32))
    d2 = jnp.maximum(d2, 0.0)                                   # guard cancellation
    qraw = 1.0 / (1.0 + d2)
    lane = jax.lax.broadcasted_iota(jnp.int32, qraw.shape, 1)
    qm = jnp.where(lane < num_experts, qraw, 0.0)               # mask padded cols
    q = qm / jnp.sum(qm, axis=1, keepdims=True)                 # exact normalization

    # single lane-dense output slab: [clf | z | q], each a 128-wide block
    out_ref[...] = jnp.concatenate([clf_blk, z, q], axis=1)


# --------------------------------------------------------------------------
# Parameter init (deterministic, synthetic)
# --------------------------------------------------------------------------
def xavier_uniform(key, shape):
    limit = (6.0 / (shape[0] + shape[1])) ** 0.5
    return jax.random.uniform(key, shape, jnp.float32, -limit, limit)


def init_params(key, num_layer, emb_dim, gate_dim, num_tasks, num_experts):
    keys = jax.random.split(key, 8 + 8 * num_layer)
    ki = iter(keys)
    p = {
        "x_emb1": xavier_uniform(next(ki), (120, emb_dim)),   # num_atom_type
        "x_emb2": xavier_uniform(next(ki), (3, emb_dim)),     # num_chirality_tag
        "layers": [],
        "gate_w1": jax.random.normal(next(ki), (emb_dim, gate_dim)) * 0.05,
        "gate_b1": jnp.zeros((gate_dim,), jnp.float32),
        "gate_gamma": jnp.ones((gate_dim,), jnp.float32),
        "gate_beta": jnp.zeros((gate_dim,), jnp.float32),
        "gate_w2": jax.random.normal(next(ki), (gate_dim, gate_dim)) * 0.05,
        "gate_b2": jnp.zeros((gate_dim,), jnp.float32),
        "cluster": jax.random.normal(next(ki), (num_experts, gate_dim))
                   * ((2.0 / (num_experts + gate_dim)) ** 0.5),       # xavier_normal_
        "experts_w": jax.random.uniform(next(ki), (emb_dim, num_tasks * num_experts),
                                        jnp.float32,
                                        -(1.0 / emb_dim ** 0.5), 1.0 / emb_dim ** 0.5),
        "experts_b": jax.random.uniform(next(ki), (num_tasks * num_experts,),
                                        jnp.float32,
                                        -(1.0 / emb_dim ** 0.5), 1.0 / emb_dim ** 0.5),
    }
    # TODO(synk): scf_emb is a parameter of the module but unused in forward(); omitted.
    for _ in range(num_layer):
        p["layers"].append({
            "edge_emb1": xavier_uniform(next(ki), (6, emb_dim)),   # num_bond_type
            "edge_emb2": xavier_uniform(next(ki), (3, emb_dim)),   # num_bond_direction
            "w1": jax.random.normal(next(ki), (emb_dim, 2 * emb_dim)) * 0.05,
            "b1": jnp.zeros((2 * emb_dim,), jnp.float32),
            "w2": jax.random.normal(next(ki), (2 * emb_dim, emb_dim)) * 0.05,
            "b2": jnp.zeros((emb_dim,), jnp.float32),
            "gamma": jnp.ones((emb_dim,), jnp.float32),
            "beta": jnp.zeros((emb_dim,), jnp.float32),
        })
    return p


# --------------------------------------------------------------------------
# Forward pass: XLA glue (embeddings / adjacency / padding) + one fused
# Pallas kernel.  Fully jittable (num_graphs etc. are static).
# --------------------------------------------------------------------------
def gnn_topexpert_forward(params, x, edge_index, edge_attr, batch,
                          num_graphs, num_layer, num_tasks, num_experts):
    n = x.shape[0]
    emb_dim = params["x_emb1"].shape[1]
    gate_dim = params["gate_w1"].shape[1]
    hid = 2 * emb_dim

    DP = _rup(emb_dim)              # padded feature width
    HP = _rup(hid)                  # padded MLP hidden width
    GP = _rup(gate_dim)             # padded gate width
    TE = num_tasks * num_experts
    CLF_W = _rup(TE)                # padded expert-head width
    QW = _rup(num_experts)          # padded q width

    # node input embedding (table lookup — glue), lane-padded
    h0 = (jnp.take(params["x_emb1"], x[:, 0], axis=0)
          + jnp.take(params["x_emb2"], x[:, 1], axis=0)).astype(jnp.float32)
    h0 = _pad_last(h0, DP)

    # add self loops: attr = [4, 0]
    self_idx = jnp.arange(n, dtype=edge_index.dtype)
    src = jnp.concatenate([edge_index[0], self_idx])
    tgt = jnp.concatenate([edge_index[1], self_idx])
    loop_attr = jnp.stack([jnp.full((n,), 4, edge_attr.dtype),
                           jnp.zeros((n,), edge_attr.dtype)], axis=1)
    ea = jnp.concatenate([edge_attr, loop_attr], axis=0)

    # [N,N] aggregation operator: A[t, s] = #edges s->t (incl. self loops).
    # bf16 is exact for per-pair multi-edge counts <= 256 (true for molecules).
    adj = jnp.zeros((n, n), jnp.float32).at[tgt, src].add(1.0).astype(jnp.bfloat16)

    # per-layer edge-embedding term pre-aggregated onto target nodes (segment-sum)
    eagg = []
    for l in range(num_layer):
        lp = params["layers"][l]
        eemb = (jnp.take(lp["edge_emb1"], ea[:, 0], axis=0)
                + jnp.take(lp["edge_emb2"], ea[:, 1], axis=0)).astype(jnp.float32)
        eagg.append(jnp.zeros((n, emb_dim), jnp.float32).at[tgt].add(eemb))
    eagg = _pad_last(jnp.stack(eagg), DP)                          # [L, N, DP]

    # stacked, zero-padded per-layer MLP / BatchNorm parameters
    lays = params["layers"]
    w1 = jnp.stack([_pad2(lays[l]["w1"], DP, HP) for l in range(num_layer)]).astype(jnp.bfloat16)
    w2 = jnp.stack([_pad2(lays[l]["w2"], HP, DP) for l in range(num_layer)]).astype(jnp.bfloat16)
    b1 = jnp.stack([_pad_last(lays[l]["b1"], HP) for l in range(num_layer)])[:, None, :]
    b2 = jnp.stack([_pad_last(lays[l]["b2"], DP) for l in range(num_layer)])[:, None, :]
    gamma = jnp.stack([_pad_last(lays[l]["gamma"], DP) for l in range(num_layer)])[:, None, :]
    beta = jnp.stack([_pad_last(lays[l]["beta"], DP) for l in range(num_layer)])[:, None, :]

    # pooling operator: add-pool matrix + inverse counts (mean = add * 1/count)
    graph_ids = jnp.arange(num_graphs, dtype=batch.dtype)
    pool_sum_f32 = (graph_ids[:, None] == batch[None, :]).astype(jnp.float32)   # [B, N]
    inv_counts = 1.0 / jnp.sum(pool_sum_f32, axis=1, keepdims=True)             # [B, 1]
    pool_sum = pool_sum_f32.astype(jnp.bfloat16)

    # fused head weight [experts_w | gate_w1] in 128-lane-aligned blocks
    head_w = jnp.concatenate([_pad2(params["experts_w"], DP, CLF_W),
                              _pad2(params["gate_w1"], DP, GP)],
                             axis=1).astype(jnp.bfloat16)                        # [DP, CLF_W+GP]
    experts_b = _pad_last(params["experts_b"][None, :], CLF_W)
    gate_b1 = _pad_last(params["gate_b1"][None, :], GP)
    gate_gamma = _pad_last(params["gate_gamma"][None, :], GP)
    gate_beta = _pad_last(params["gate_beta"][None, :], GP)
    gw2 = _pad2(params["gate_w2"], GP, GP).astype(jnp.bfloat16)
    gate_b2 = _pad_last(params["gate_b2"][None, :], GP)

    clusterT = _pad2(params["cluster"].T, GP, QW).astype(jnp.float32)            # [GP, QW]
    c_sq = jnp.sum(clusterT * clusterT, axis=0, keepdims=True)                   # [1, QW]

    inputs = (h0, adj, eagg, w1, b1, w2, b2, gamma, beta, pool_sum, inv_counts,
              head_w, experts_b, gate_b1, gate_gamma, gate_beta, gw2, gate_b2,
              clusterT, c_sq)

    slab_w = CLF_W + GP + QW
    out_shape = jax.ShapeDtypeStruct((num_graphs, slab_w), jnp.float32)

    # dtype-aware VMEM budget (+2x margin for buffering), clamped to HW capacity
    vmem_bytes = sum(_padded_vmem_bytes(a.shape, a.dtype) for a in inputs)
    vmem_bytes += _padded_vmem_bytes(out_shape.shape, out_shape.dtype)
    vmem_limit = max(4 * 1024 * 1024, 2 * int(vmem_bytes))
    vmem_limit = min(vmem_limit, 128 * 1024 * 1024)
    try:
        info_fn = getattr(pltpu, "get_tpu_info", None)
        cap = getattr(info_fn(), "vmem_capacity_bytes", None) if info_fn else None
        if cap:
            vmem_limit = min(vmem_limit, int(cap) * 3 // 4)   # v7x: 64 MiB total
    except Exception:
        pass

    kernel = functools.partial(fused_forward_kernel,
                               num_layer=num_layer, num_experts=num_experts)
    slab = pl.pallas_call(
        kernel,
        out_shape=out_shape,
        in_specs=[_vmem()] * len(inputs),
        out_specs=_vmem(),
        compiler_params=pltpu.CompilerParams(vmem_limit_bytes=vmem_limit),
    )(*inputs)

    clf_logit = slab[:, :TE].reshape(num_graphs, num_tasks, num_experts)
    z = slab[:, CLF_W:CLF_W + gate_dim]
    q = slab[:, CLF_W + GP:CLF_W + GP + num_experts]
    return clf_logit, z, q


# --------------------------------------------------------------------------
if __name__ == "__main__":
    NUM_LAYER = 2
    EMB_DIM = 32
    GATE_DIM = 32
    NUM_TASKS = 4
    NUM_EXPERTS = 3
    N_NODES = 16
    N_EDGES = 24
    N_GRAPHS = 2

    key = jax.random.PRNGKey(0)
    kp, kx1, kx2, ks, kd, kb1, kb2 = jax.random.split(key, 7)

    params = init_params(kp, NUM_LAYER, EMB_DIM, GATE_DIM, NUM_TASKS, NUM_EXPERTS)

    # synthetic molecular graph batch
    x = jnp.stack([jax.random.randint(kx1, (N_NODES,), 0, 120),
                   jax.random.randint(kx2, (N_NODES,), 0, 3)], axis=1).astype(jnp.int32)
    edge_index = jnp.stack([jax.random.randint(ks, (N_EDGES,), 0, N_NODES),
                            jax.random.randint(kd, (N_EDGES,), 0, N_NODES)],
                           axis=0).astype(jnp.int32)
    edge_attr = jnp.stack([jax.random.randint(kb1, (N_EDGES,), 0, 4),
                           jax.random.randint(kb2, (N_EDGES,), 0, 3)],
                          axis=1).astype(jnp.int32)
    batch = jnp.concatenate([jnp.zeros((N_NODES // 2,), jnp.int32),
                             jnp.ones((N_NODES - N_NODES // 2,), jnp.int32)])

    forward = jax.jit(
        gnn_topexpert_forward,
        static_argnames=("num_graphs", "num_layer", "num_tasks", "num_experts"))

    clf_logit, z, q = forward(params, x, edge_index, edge_attr, batch,
                              num_graphs=N_GRAPHS, num_layer=NUM_LAYER,
                              num_tasks=NUM_TASKS, num_experts=NUM_EXPERTS)

    jax.block_until_ready((clf_logit, z, q))
    assert clf_logit.shape == (N_GRAPHS, NUM_TASKS, NUM_EXPERTS)
    assert z.shape == (N_GRAPHS, GATE_DIM)
    assert q.shape == (N_GRAPHS, NUM_EXPERTS)
    assert bool(jnp.all(jnp.isfinite(clf_logit)))
    assert bool(jnp.all(jnp.isfinite(z)))
    assert bool(jnp.all(jnp.isfinite(q)))
    # q rows are exactly normalized (exact divide in-kernel)
    assert bool(jnp.all(jnp.abs(jnp.sum(q, axis=1) - 1.0) < 1e-4))
    assert bool(jnp.all(q >= 0.0))
    print("KERNEL_OK")
</pallas_src>

<mosaic_0001>
module attributes {stable_mosaic.version = 11 : i64} {
  func.func @fused_forward_kernel(%arg0: memref<16x128xf32, #tpu.memory_space<vmem>>, %arg1: memref<16x16xbf16, #tpu.memory_space<vmem>>, %arg2: memref<2x16x128xf32, #tpu.memory_space<vmem>>, %arg3: memref<2x128x128xbf16, #tpu.memory_space<vmem>>, %arg4: memref<2x1x128xf32, #tpu.memory_space<vmem>>, %arg5: memref<2x128x128xbf16, #tpu.memory_space<vmem>>, %arg6: memref<2x1x128xf32, #tpu.memory_space<vmem>>, %arg7: memref<2x1x128xf32, #tpu.memory_space<vmem>>, %arg8: memref<2x1x128xf32, #tpu.memory_space<vmem>>, %arg9: memref<2x16xbf16, #tpu.memory_space<vmem>>, %arg10: memref<2x1xf32, #tpu.memory_space<vmem>>, %arg11: memref<128x256xbf16, #tpu.memory_space<vmem>>, %arg12: memref<1x128xf32, #tpu.memory_space<vmem>>, %arg13: memref<1x128xf32, #tpu.memory_space<vmem>>, %arg14: memref<1x128xf32, #tpu.memory_space<vmem>>, %arg15: memref<1x128xf32, #tpu.memory_space<vmem>>, %arg16: memref<128x128xbf16, #tpu.memory_space<vmem>>, %arg17: memref<1x128xf32, #tpu.memory_space<vmem>>, %arg18: memref<128x128xf32, #tpu.memory_space<vmem>>, %arg19: memref<1x128xf32, #tpu.memory_space<vmem>>, %arg20: memref<2x384xf32, #tpu.memory_space<vmem>>) attributes {dimension_semantics = [], scalar_prefetch = 0 : i64, scratch_operands = 0 : i64, tpu.core_type = #tpu.core_type<tc>} {
    %c0 = arith.constant 0 : index
    %c0_0 = arith.constant 0 : index
    %0 = vector.load %arg0[%c0, %c0_0] : memref<16x128xf32, #tpu.memory_space<vmem>>, vector<16x128xf32>
    %c0_1 = arith.constant 0 : index
    %c0_2 = arith.constant 0 : index
    %1 = vector.load %arg1[%c0_1, %c0_2] : memref<16x16xbf16, #tpu.memory_space<vmem>>, vector<16x16xbf16>
    %2 = arith.truncf %0 : vector<16x128xf32> to vector<16x128xbf16>
    %cst = arith.constant dense<0.000000e+00> : vector<16x128xf32>
    %3 = tpu.matmul %1, %2, %cst {dimension_numbers = #tpu.dot_dimension_numbers<[1], [0], [0], [1], [0, 0, 1, 1], [], []>} : vector<16x16xbf16>, vector<16x128xbf16>, vector<16x128xf32> -> vector<16x128xf32>
    %c0_3 = arith.constant 0 : index
    %c0_4 = arith.constant 0 : index
    %c0_5 = arith.constant 0 : index
    %4 = vector.load %arg2[%c0_3, %c0_4, %c0_5] : memref<2x16x128xf32, #tpu.memory_space<vmem>>, vector<1x16x128xf32>
    %5 = vector.shape_cast %4 : vector<1x16x128xf32> to vector<16x128xf32>
    %6 = arith.addf %3, %5 : vector<16x128xf32>
    %7 = arith.truncf %6 : vector<16x128xf32> to vector<16x128xbf16>
    %c0_6 = arith.constant 0 : index
    %c0_7 = arith.constant 0 : index
    %c0_8 = arith.constant 0 : index
    %8 = vector.load %arg3[%c0_6, %c0_7, %c0_8] : memref<2x128x128xbf16, #tpu.memory_space<vmem>>, vector<1x128x128xbf16>
    %9 = vector.shape_cast %8 : vector<1x128x128xbf16> to vector<128x128xbf16>
    %cst_9 = arith.constant dense<0.000000e+00> : vector<16x128xf32>
    %10 = tpu.matmul %7, %9, %cst_9 {dimension_numbers = #tpu.dot_dimension_numbers<[1], [0], [0], [1], [0, 0, 1, 1], [], []>} : vector<16x128xbf16>, vector<128x128xbf16>, vector<16x128xf32> -> vector<16x128xf32>
    %c0_10 = arith.constant 0 : index
    %c0_11 = arith.constant 0 : index
    %c0_12 = arith.constant 0 : index
    %11 = vector.load %arg4[%c0_10, %c0_11, %c0_12] : memref<2x1x128xf32, #tpu.memory_space<vmem>>, vector<1x1x128xf32>
    %12 = vector.shape_cast %11 : vector<1x1x128xf32> to vector<1x128xf32>
    %13 = vector.broadcast %12 : vector<1x128xf32> to vector<16x128xf32>
    %14 = arith.addf %10, %13 : vector<16x128xf32>
    %cst_13 = arith.constant 0.000000e+00 : f32
    %15 = vector.broadcast %cst_13 : f32 to vector<16x128xf32>
    %16 = arith.maximumf %14, %15 : vector<16x128xf32>
    %17 = arith.truncf %16 : vector<16x128xf32> to vector<16x128xbf16>
    %c0_14 = arith.constant 0 : index
    %c0_15 = arith.constant 0 : index
    %c0_16 = arith.constant 0 : index
    %18 = vector.load %arg5[%c0_14, %c0_15, %c0_16] : memref<2x128x128xbf16, #tpu.memory_space<vmem>>, vector<1x128x128xbf16>
    %19 = vector.shape_cast %18 : vector<1x128x128xbf16> to vector<128x128xbf16>
    %cst_17 = arith.constant dense<0.000000e+00> : vector<16x128xf32>
    %20 = tpu.matmul %17, %19, %cst_17 {dimension_numbers = #tpu.dot_dimension_numbers<[1], [0], [0], [1], [0, 0, 1, 1], [], []>} : vector<16x128xbf16>, vector<128x128xbf16>, vector<16x128xf32> -> vector<16x128xf32>
    %c0_18 = arith.constant 0 : index
    %c0_19 = arith.constant 0 : index
    %c0_20 = arith.constant 0 : index
    %21 = vector.load %arg6[%c0_18, %c0_19, %c0_20] : memref<2x1x128xf32, #tpu.memory_space<vmem>>, vector<1x1x128xf32>
    %22 = vector.shape_cast %21 : vector<1x1x128xf32> to vector<1x128xf32>
    %23 = vector.broadcast %22 : vector<1x128xf32> to vector<16x128xf32>
    %24 = arith.addf %20, %23 : vector<16x128xf32>
    %25 = arith.mulf %24, %24 : vector<16x128xf32>
    %26 = tpu.concatenate %24, %25 in 1 : vector<16x128xf32>, vector<16x128xf32> -> vector<16x256xf32>
    %cst_21 = arith.constant dense<0.000000e+00> : vector<256xf32>
    %27 = vector.multi_reduction <add>, %26, %cst_21 [0] : vector<16x256xf32> to vector<256xf32>
    %28 = vector.shape_cast %27 : vector<256xf32> to vector<1x256xf32>
    %cst_22 = arith.constant 6.250000e-02 : f32
    %29 = vector.broadcast %cst_22 : f32 to vector<1x256xf32>
    %30 = arith.mulf %28, %29 : vector<1x256xf32>
    %31 = vector.extract_strided_slice %30 {offsets = [0, 0], sizes = [1, 128], strides = [1, 1]} : vector<1x256xf32> to vector<1x128xf32>
    %32 = vector.extract_strided_slice %30 {offsets = [0, 128], sizes = [1, 128], strides = [1, 1]} : vector<1x256xf32> to vector<1x128xf32>
    %33 = arith.mulf %31, %31 : vector<1x128xf32>
    %34 = arith.subf %32, %33 : vector<1x128xf32>
    %cst_23 = arith.constant 0.000000e+00 : f32
    %35 = vector.broadcast %cst_23 : f32 to vector<1x128xf32>
    %36 = arith.maximumf %34, %35 : vector<1x128xf32>
    %37 = vector.broadcast %31 : vector<1x128xf32> to vector<16x128xf32>
    %38 = arith.subf %24, %37 : vector<16x128xf32>
    %cst_24 = arith.constant 9.99999974E-6 : f32
    %39 = vector.broadcast %cst_24 : f32 to vector<1x128xf32>
    %40 = arith.addf %36, %39 : vector<1x128xf32>
    %41 = math.rsqrt %40 : vector<1x128xf32>
    %42 = vector.broadcast %41 : vector<1x128xf32> to vector<16x128xf32>
    %43 = arith.mulf %38, %42 : vector<16x128xf32>
    %c0_25 = arith.constant 0 : index
    %c0_26 = arith.constant 0 : index
    %c0_27 = arith.constant 0 : index
    %44 = vector.load %arg7[%c0_25, %c0_26, %c0_27] : memref<2x1x128xf32, #tpu.memory_space<vmem>>, vector<1x1x128xf32>
    %45 = vector.shape_cast %44 : vector<1x1x128xf32> to vector<1x128xf32>
    %46 = vector.broadcast %45 : vector<1x128xf32> to vector<16x128xf32>
    %47 = arith.mulf %43, %46 : vector<16x128xf32>
    %c0_28 = arith.constant 0 : index
    %c0_29 = arith.constant 0 : index
    %c0_30 = arith.constant 0 : index
    %48 = vector.load %arg8[%c0_28, %c0_29, %c0_30] : memref<2x1x128xf32, #tpu.memory_space<vmem>>, vector<1x1x128xf32>
    %49 = vector.shape_cast %48 : vector<1x1x128xf32> to vector<1x128xf32>
    %50 = vector.broadcast %49 : vector<1x128xf32> to vector<16x128xf32>
    %51 = arith.addf %47, %50 : vector<16x128xf32>
    %cst_31 = arith.constant 0.000000e+00 : f32
    %52 = vector.broadcast %cst_31 : f32 to vector<16x128xf32>
    %53 = arith.maximumf %51, %52 : vector<16x128xf32>
    %54 = arith.truncf %53 : vector<16x128xf32> to vector<16x128xbf16>
    %cst_32 = arith.constant dense<0.000000e+00> : vector<16x128xf32>
    %55 = tpu.matmul %1, %54, %cst_32 {dimension_numbers = #tpu.dot_dimension_numbers<[1], [0], [0], [1], [0, 0, 1, 1], [], []>} : vector<16x16xbf16>, vector<16x128xbf16>, vector<16x128xf32> -> vector<16x128xf32>
    %c1 = arith.constant 1 : index
    %c0_33 = arith.constant 0 : index
    %c0_34 = arith.constant 0 : index
    %56 = vector.load %arg2[%c1, %c0_33, %c0_34] : memref<2x16x128xf32, #tpu.memory_space<vmem>>, vector<1x16x128xf32>
    %57 = vector.shape_cast %56 : vector<1x16x128xf32> to vector<16x128xf32>
    %58 = arith.addf %55, %57 : vector<16x128xf32>
    %59 = arith.truncf %58 : vector<16x128xf32> to vector<16x128xbf16>
    %c1_35 = arith.constant 1 : index
    %c0_36 = arith.constant 0 : index
    %c0_37 = arith.constant 0 : index
    %60 = vector.load %arg3[%c1_35, %c0_36, %c0_37] : memref<2x128x128xbf16, #tpu.memory_space<vmem>>, vector<1x128x128xbf16>
    %61 = vector.shape_cast %60 : vector<1x128x128xbf16> to vector<128x128xbf16>
    %cst_38 = arith.constant dense<0.000000e+00> : vector<16x128xf32>
    %62 = tpu.matmul %59, %61, %cst_38 {dimension_numbers = #tpu.dot_dimension_numbers<[1], [0], [0], [1], [0, 0, 1, 1], [], []>} : vector<16x128xbf16>, vector<128x128xbf16>, vector<16x128xf32> -> vector<16x128xf32>
    %c1_39 = arith.constant 1 : index
    %c0_40 = arith.constant 0 : index
    %c0_41 = arith.constant 0 : index
    %63 = vector.load %arg4[%c1_39, %c0_40, %c0_41] : memref<2x1x128xf32, #tpu.memory_space<vmem>>, vector<1x1x128xf32>
    %64 = vector.shape_cast %63 : vector<1x1x128xf32> to vector<1x128xf32>
    %65 = vector.broadcast %64 : vector<1x128xf32> to vector<16x128xf32>
    %66 = arith.addf %62, %65 : vector<16x128xf32>
    %cst_42 = arith.constant 0.000000e+00 : f32
    %67 = vector.broadcast %cst_42 : f32 to vector<16x128xf32>
    %68 = arith.maximumf %66, %67 : vector<16x128xf32>
    %69 = arith.truncf %68 : vector<16x128xf32> to vector<16x128xbf16>
    %c1_43 = arith.constant 1 : index
    %c0_44 = arith.constant 0 : index
    %c0_45 = arith.constant 0 : index
    %70 = vector.load %arg5[%c1_43, %c0_44, %c0_45] : memref<2x128x128xbf16, #tpu.memory_space<vmem>>, vector<1x128x128xbf16>
    %71 = vector.shape_cast %70 : vector<1x128x128xbf16> to vector<128x128xbf16>
    %cst_46 = arith.constant dense<0.000000e+00> : vector<16x128xf32>
    %72 = tpu.matmul %69, %71, %cst_46 {dimension_numbers = #tpu.dot_dimension_numbers<[1], [0], [0], [1], [0, 0, 1, 1], [], []>} : vector<16x128xbf16>, vector<128x128xbf16>, vector<16x128xf32> -> vector<16x128xf32>
    %c1_47 = arith.constant 1 : index
    %c0_48 = arith.constant 0 : index
    %c0_49 = arith.constant 0 : index
    %73 = vector.load %arg6[%c1_47, %c0_48, %c0_49] : memref<2x1x128xf32, #tpu.memory_space<vmem>>, vector<1x1x128xf32>
    %74 = vector.shape_cast %73 : vector<1x1x128xf32> to vector<1x128xf32>
    %75 = vector.broadcast %74 : vector<1x128xf32> to vector<16x128xf32>
    %76 = arith.addf %72, %75 : vector<16x128xf32>
    %77 = arith.mulf %76, %76 : vector<16x128xf32>
    %78 = tpu.concatenate %76, %77 in 1 : vector<16x128xf32>, vector<16x128xf32> -> vector<16x256xf32>
    %cst_50 = arith.constant dense<0.000000e+00> : vector<256xf32>
    %79 = vector.multi_reduction <add>, %78, %cst_50 [0] : vector<16x256xf32> to vector<256xf32>
    %80 = vector.shape_cast %79 : vector<256xf32> to vector<1x256xf32>
    %cst_51 = arith.constant 6.250000e-02 : f32
    %81 = vector.broadcast %cst_51 : f32 to vector<1x256xf32>
    %82 = arith.mulf %80, %81 : vector<1x256xf32>
    %83 = vector.extract_strided_slice %82 {offsets = [0, 0], sizes = [1, 128], strides = [1, 1]} : vector<1x256xf32> to vector<1x128xf32>
    %84 = vector.extract_strided_slice %82 {offsets = [0, 128], sizes = [1, 128], strides = [1, 1]} : vector<1x256xf32> to vector<1x128xf32>
    %85 = arith.mulf %83, %83 : vector<1x128xf32>
    %86 = arith.subf %84, %85 : vector<1x128xf32>
    %cst_52 = arith.constant 0.000000e+00 : f32
    %87 = vector.broadcast %cst_52 : f32 to vector<1x128xf32>
    %88 = arith.maximumf %86, %87 : vector<1x128xf32>
    %89 = vector.broadcast %83 : vector<1x128xf32> to vector<16x128xf32>
    %90 = arith.subf %76, %89 : vector<16x128xf32>
    %cst_53 = arith.constant 9.99999974E-6 : f32
    %91 = vector.broadcast %cst_53 : f32 to vector<1x128xf32>
    %92 = arith.addf %88, %91 : vector<1x128xf32>
    %93 = math.rsqrt %92 : vector<1x128xf32>
    %94 = vector.broadcast %93 : vector<1x128xf32> to vector<16x128xf32>
    %95 = arith.mulf %90, %94 : vector<16x128xf32>
    %c1_54 = arith.constant 1 : index
    %c0_55 = arith.constant 0 : index
    %c0_56 = arith.constant 0 : index
    %96 = vector.load %arg7[%c1_54, %c0_55, %c0_56] : memref<2x1x128xf32, #tpu.memory_space<vmem>>, vector<1x1x128xf32>
    %97 = vector.shape_cast %96 : vector<1x1x128xf32> to vector<1x128xf32>
    %98 = vector.broadcast %97 : vector<1x128xf32> to vector<16x128xf32>
    %99 = arith.mulf %95, %98 : vector<16x128xf32>
    %c1_57 = arith.constant 1 : index
    %c0_58 = arith.constant 0 : index
    %c0_59 = arith.constant 0 : index
    %100 = vector.load %arg8[%c1_57, %c0_58, %c0_59] : memref<2x1x128xf32, #tpu.memory_space<vmem>>, vector<1x1x128xf32>
    %101 = vector.shape_cast %100 : vector<1x1x128xf32> to vector<1x128xf32>
    %102 = vector.broadcast %101 : vector<1x128xf32> to vector<16x128xf32>
    %103 = arith.addf %99, %102 : vector<16x128xf32>
    %c0_60 = arith.constant 0 : index
    %c0_61 = arith.constant 0 : index
    %104 = vector.load %arg9[%c0_60, %c0_61] : memref<2x16xbf16, #tpu.memory_space<vmem>>, vector<2x16xbf16>
    %105 = arith.truncf %103 : vector<16x128xf32> to vector<16x128xbf16>
    %cst_62 = arith.constant dense<0.000000e+00> : vector<2x128xf32>
    %106 = tpu.matmul %104, %105, %cst_62 {dimension_numbers = #tpu.dot_dimension_numbers<[1], [0], [0], [1], [0, 0, 1, 1], [], []>} : vector<2x16xbf16>, vector<16x128xbf16>, vector<2x128xf32> -> vector<2x128xf32>
    %107 = arith.truncf %106 : vector<2x128xf32> to vector<2x128xbf16>
    %c0_63 = arith.constant 0 : index
    %c0_64 = arith.constant 0 : index
    %108 = vector.load %arg11[%c0_63, %c0_64] : memref<128x256xbf16, #tpu.memory_space<vmem>>, vector<128x256xbf16>
    %cst_65 = arith.constant dense<0.000000e+00> : vector<2x256xf32>
    %109 = tpu.matmul %107, %108, %cst_65 {dimension_numbers = #tpu.dot_dimension_numbers<[1], [0], [0], [1], [0, 0, 1, 1], [], []>} : vector<2x128xbf16>, vector<128x256xbf16>, vector<2x256xf32> -> vector<2x256xf32>
    %110 = vector.extract_strided_slice %109 {offsets = [0, 0], sizes = [2, 128], strides = [1, 1]} : vector<2x256xf32> to vector<2x128xf32>
    %c0_66 = arith.constant 0 : index
    %c0_67 = arith.constant 0 : index
    %111 = vector.load %arg10[%c0_66, %c0_67] : memref<2x1xf32, #tpu.memory_space<vmem>>, vector<2x1xf32>
    %112 = vector.broadcast %111 : vector<2x1xf32> to vector<2x128xf32>
    %113 = arith.mulf %110, %112 : vector<2x128xf32>
    %c0_68 = arith.constant 0 : index
    %c0_69 = arith.constant 0 : index
    %114 = vector.load %arg12[%c0_68, %c0_69] : memref<1x128xf32, #tpu.memory_space<vmem>>, vector<1x128xf32>
    %115 = vector.broadcast %114 : vector<1x128xf32> to vector<2x128xf32>
    %116 = arith.addf %113, %115 : vector<2x128xf32>
    %117 = vector.extract_strided_slice %109 {offsets = [0, 128], sizes = [2, 128], strides = [1, 1]} : vector<2x256xf32> to vector<2x128xf32>
    %c0_70 = arith.constant 0 : index
    %c0_71 = arith.constant 0 : index
    %118 = vector.load %arg13[%c0_70, %c0_71] : memref<1x128xf32, #tpu.memory_space<vmem>>, vector<1x128xf32>
    %119 = vector.broadcast %118 : vector<1x128xf32> to vector<2x128xf32>
    %120 = arith.addf %117, %119 : vector<2x128xf32>
    %121 = arith.mulf %120, %120 : vector<2x128xf32>
    %122 = tpu.concatenate %120, %121 in 1 : vector<2x128xf32>, vector<2x128xf32> -> vector<2x256xf32>
    %cst_72 = arith.constant dense<0.000000e+00> : vector<256xf32>
    %123 = vector.multi_reduction <add>, %122, %cst_72 [0] : vector<2x256xf32> to vector<256xf32>
    %124 = vector.shape_cast %123 : vector<256xf32> to vector<1x256xf32>
    %cst_73 = arith.constant 5.000000e-01 : f32
    %125 = vector.broadcast %cst_73 : f32 to vector<1x256xf32>
    %126 = arith.mulf %124, %125 : vector<1x256xf32>
    %127 = vector.extract_strided_slice %126 {offsets = [0, 0], sizes = [1, 128], strides = [1, 1]} : vector<1x256xf32> to vector<1x128xf32>
    %128 = vector.extract_strided_slice %126 {offsets = [0, 128], sizes = [1, 128], strides = [1, 1]} : vector<1x256xf32> to vector<1x128xf32>
    %129 = arith.mulf %127, %127 : vector<1x128xf32>
    %130 = arith.subf %128, %129 : vector<1x128xf32>
    %cst_74 = arith.constant 0.000000e+00 : f32
    %131 = vector.broadcast %cst_74 : f32 to vector<1x128xf32>
    %132 = arith.maximumf %130, %131 : vector<1x128xf32>
    %133 = vector.broadcast %127 : vector<1x128xf32> to vector<2x128xf32>
    %134 = arith.subf %120, %133 : vector<2x128xf32>
    %cst_75 = arith.constant 9.99999974E-6 : f32
    %135 = vector.broadcast %cst_75 : f32 to vector<1x128xf32>
    %136 = arith.addf %132, %135 : vector<1x128xf32>
    %137 = math.rsqrt %136 : vector<1x128xf32>
    %138 = vector.broadcast %137 : vector<1x128xf32> to vector<2x128xf32>
    %139 = arith.mulf %134, %138 : vector<2x128xf32>
    %c0_76 = arith.constant 0 : index
    %c0_77 = arith.constant 0 : index
    %140 = vector.load %arg14[%c0_76, %c0_77] : memref<1x128xf32, #tpu.memory_space<vmem>>, vector<1x128xf32>
    %141 = vector.broadcast %140 : vector<1x128xf32> to vector<2x128xf32>
    %142 = arith.mulf %139, %141 : vector<2x128xf32>
    %c0_78 = arith.constant 0 : index
    %c0_79 = arith.constant 0 : index
    %143 = vector.load %arg15[%c0_78, %c0_79] : memref<1x128xf32, #tpu.memory_space<vmem>>, vector<1x128xf32>
    %144 = vector.broadcast %143 : vector<1x128xf32> to vector<2x128xf32>
    %145 = arith.addf %142, %144 : vector<2x128xf32>
    %cst_80 = arith.constant 0.000000e+00 : f32
    %146 = vector.broadcast %cst_80 : f32 to vector<2x128xf32>
    %147 = arith.maximumf %145, %146 : vector<2x128xf32>
    %148 = arith.truncf %147 : vector<2x128xf32> to vector<2x128xbf16>
    %c0_81 = arith.constant 0 : index
    %c0_82 = arith.constant 0 : index
    %149 = vector.load %arg16[%c0_81, %c0_82] : memref<128x128xbf16, #tpu.memory_space<vmem>>, vector<128x128xbf16>
    %cst_83 = arith.constant dense<0.000000e+00> : vector<2x128xf32>
    %150 = tpu.matmul %148, %149, %cst_83 {dimension_numbers = #tpu.dot_dimension_numbers<[1], [0], [0], [1], [0, 0, 1, 1], [], []>} : vector<2x128xbf16>, vector<128x128xbf16>, vector<2x128xf32> -> vector<2x128xf32>
    %c0_84 = arith.constant 0 : index
    %c0_85 = arith.constant 0 : index
    %151 = vector.load %arg17[%c0_84, %c0_85] : memref<1x128xf32, #tpu.memory_space<vmem>>, vector<1x128xf32>
    %152 = vector.broadcast %151 : vector<1x128xf32> to vector<2x128xf32>
    %153 = arith.addf %150, %152 : vector<2x128xf32>
    %c0_86 = arith.constant 0 : index
    %c0_87 = arith.constant 0 : index
    %154 = vector.load %arg18[%c0_86, %c0_87] : memref<128x128xf32, #tpu.memory_space<vmem>>, vector<128x128xf32>
    %155 = arith.mulf %153, %153 : vector<2x128xf32>
    %cst_88 = arith.constant dense<0.000000e+00> : vector<2xf32>
    %156 = vector.multi_reduction <add>, %155, %cst_88 [1] : vector<2x128xf32> to vector<2xf32>
    %157 = vector.shape_cast %156 : vector<2xf32> to vector<2x1xf32>
    %c0_89 = arith.constant 0 : index
    %c0_90 = arith.constant 0 : index
    %158 = vector.load %arg19[%c0_89, %c0_90] : memref<1x128xf32, #tpu.memory_space<vmem>>, vector<1x128xf32>
    %159 = vector.broadcast %157 : vector<2x1xf32> to vector<2x128xf32>
    %160 = vector.broadcast %158 : vector<1x128xf32> to vector<2x128xf32>
    %161 = arith.addf %159, %160 : vector<2x128xf32>
    %cst_91 = arith.constant dense<0.000000e+00> : vector<2x128xf32>
    %162 = tpu.matmul %153, %154, %cst_91 {dimension_numbers = #tpu.dot_dimension_numbers<[1], [0], [0], [1], [0, 0, 1, 1], [], []>} : vector<2x128xf32>, vector<128x128xf32>, vector<2x128xf32> -> vector<2x128xf32>
    %cst_92 = arith.constant 2.000000e+00 : f32
    %163 = vector.broadcast %cst_92 : f32 to vector<2x128xf32>
    %164 = arith.mulf %163, %162 : vector<2x128xf32>
    %165 = arith.subf %161, %164 : vector<2x128xf32>
    %cst_93 = arith.constant 0.000000e+00 : f32
    %166 = vector.broadcast %cst_93 : f32 to vector<2x128xf32>
    %167 = arith.maximumf %165, %166 : vector<2x128xf32>
    %cst_94 = arith.constant 1.000000e+00 : f32
    %168 = vector.broadcast %cst_94 : f32 to vector<2x128xf32>
    %169 = arith.addf %168, %167 : vector<2x128xf32>
    %cst_95 = arith.constant 1.000000e+00 : f32
    %170 = vector.broadcast %cst_95 : f32 to vector<2x128xf32>
    %171 = arith.divf %170, %169 : vector<2x128xf32>
    %172 = tpu.iota {dimensions = array<i32: 1>} : vector<2x128xi32>
    %c3_i32 = arith.constant 3 : i32
    %173 = vector.broadcast %c3_i32 : i32 to vector<2x128xi32>
    %174 = arith.cmpi slt, %172, %173 : vector<2x128xi32>
    %cst_96 = arith.constant 0.000000e+00 : f32
    %175 = vector.broadcast %cst_96 : f32 to vector<2x128xf32>
    %176 = arith.select %174, %171, %175 : vector<2x128xi1>, vector<2x128xf32>
    %cst_97 = arith.constant dense<0.000000e+00> : vector<2xf32>
    %177 = vector.multi_reduction <add>, %176, %cst_97 [1] : vector<2x128xf32> to vector<2xf32>
    %178 = vector.shape_cast %177 : vector<2xf32> to vector<2x1xf32>
    %179 = vector.broadcast %178 : vector<2x1xf32> to vector<2x128xf32>
    %180 = arith.divf %176, %179 : vector<2x128xf32>
    %181 = tpu.concatenate %116, %153, %180 in 1 : vector<2x128xf32>, vector<2x128xf32>, vector<2x128xf32> -> vector<2x384xf32>
    %c0_98 = arith.constant 0 : index
    %c0_99 = arith.constant 0 : index
    %182 = vector.load %arg20[%c0_98, %c0_99] : memref<2x384xf32, #tpu.memory_space<vmem>>, vector<2x384xf32>
    tpu.vector_store %arg20[%c0_98, %c0_99], %181 {strides = array<i32>} : memref<2x384xf32, #tpu.memory_space<vmem>>, vector<2x384xf32>,
    return
  }
}

</mosaic_0001>

<bundles_post_ra>
// kernel: gnn_topexpert_forward.1
= control target key start
LH: loop header
LB: loop body
LE: loop exit
PB: predicated region body
PF: predicated region fallthrough
CT: control target
= control target key end

     0   :  { %v1659_v0 = vmov 0.0   ;;  %vm1660_vm0 = vmmov 0   ;;  %vm78_vm1 = vcmask 130048   ;;  %vm929_vm2 = vcmask 1041408   ;;  %s2129_s0 = inlined_call_operand.vmem [shape: f32[16,128], index: 0, kind: input, shape index: {}]   ;;  %s2130_s1 = inlined_call_operand.vmem [shape: bf16[16,16], index: 1, kind: input, shape index: {}]   ;;  %s2131_s3 = inlined_call_operand.vmem [shape: bf16[2,128,128], index: 3, kind: input, shape index: {}]   ;;  %s2132_s5 = inlined_call_operand.vmem [shape: bf16[2,128,128], index: 5, kind: input, shape index: {}]   ;;  %s2133_s2 = inlined_call_operand.vmem [shape: f32[2,16,128], index: 2, kind: input, shape index: {}]   ;;  %s2134_s4 = inlined_call_operand.vmem [shape: f32[2,1,128], index: 4, kind: input, shape index: {}]   ;;  %s2135_s6 = inlined_call_operand.vmem [shape: f32[2,1,128], index: 6, kind: input, shape index: {}]   ;;  %s2136_s7 = inlined_call_operand.vmem [shape: f32[2,1,128], index: 7, kind: input, shape index: {}]   ;;  %s2137_s8 = inlined_call_operand.vmem [shape: f32[2,1,128], index: 8, kind: input, shape index: {}]   ;;  %s2138_s11 = inlined_call_operand.vmem [shape: bf16[128,256], index: 11, kind: input, shape index: {}]   ;;  %s2139_s9 = inlined_call_operand.vmem [shape: bf16[2,16], index: 9, kind: input, shape index: {}]   ;;  %s2140_s10 = inlined_call_operand.vmem [shape: f32[2,1], index: 10, kind: input, shape index: {}]   ;;  %s2141_s16 = inlined_call_operand.vmem [shape: bf16[128,128], index: 16, kind: input, shape index: {}]   ;;  %s2142_s18 = inlined_call_operand.vmem [shape: f32[128,128], index: 18, kind: input, shape index: {}]   ;;  %s2143_s13 = inlined_call_operand.vmem [shape: f32[1,128], index: 13, kind: input, shape index: {}]   ;;  %s2144_s14 = inlined_call_operand.vmem [shape: f32[1,128], index: 14, kind: input, shape index: {}]   ;;  %s2145_s15 = inlined_call_operand.vmem [shape: f32[1,128], index: 15, kind: input, shape index: {}]   ;;  %s2146_s12 = inlined_call_operand.vmem [shape: f32[1,128], index: 12, kind: input, shape index: {}]   ;;  %s2147_s17 = inlined_call_operand.vmem [shape: f32[1,128], index: 17, kind: input, shape index: {}]   ;;  %s2148_s19 = inlined_call_operand.vmem [shape: f32[1,128], index: 19, kind: input, shape index: {}]   ;;  %s2149_s20 = inlined_call_operand.vmem [shape: f32[2,384], index: 20, kind: output, shape index: {}]  }
   0x1   :  { %2154 = sst [smem:[#allocation2_spill]] %s2129_s0  ;;  %1400 = vmatprep.subr.bf16.mxu0 %v1659_v0  ;;  %1402 = vmatprep.mubr.msk.bf16.mxu0 %vm1660_vm0, %v1659_v0  ;;  %v1222_v30 = vld [vmem:[%s2134_s4] ss:$0 sm:$0xff] }
   0x2   :  { %2155 = sst [smem:[#allocation3_spill]] %s2130_s1  ;;  %s2159_s23 = sld [smem:[#allocation2_spill]]  ;;  %1406 = vmatprep.subr.bf16.mxu1 %v1659_v0  ;;  %1422 = vmatprep.mubr.msk.bf16.mxu1 %vm1660_vm0, %v1659_v0  ;;  %v1231_v40 = vld [vmem:[%s2135_s6] ss:$0 sm:$0xff] }
   0x3   :  { %2156 = sst [smem:[#allocation4_spill]] %s2131_s3  ;;  %s2160_s26 = sld [smem:[#allocation3_spill]] }
   0x4   :  { %2157 = sst [smem:[#allocation5_spill]] %s2132_s5 }
   0x5   :  { %2158 = sst [smem:[#allocation6_spill]] %s2133_s2  ;;  %s2161_s2 = sld [smem:[#allocation4_spill]] }
   0x6   :  { %s2162_s0 = sld [smem:[#allocation5_spill]]  ;;  %s2163_s30 = sld [smem:[#allocation6_spill]] }
   0x8   :  { %v66_v1 = vld [vmem:[%s2159_s23] sm:$0xff]  ;;  %v67_v2 = vld [vmem:[%s2159_s23 + $0x8] sm:$0xff] }
   0x9   :  { %v70_v3 = vpack.c.bf16 %v67_v2, %v66_v1  ;;  %v1781_v4 = vld [vmem:[%s2160_s26] sm:$0xff]  }
   0xb   :  { %v1585_v5 = vld [vmem:[%s2161_s2] sm:$0xff]   ;;  %1401 = vmatpush3.bf16.msra.mxu0 %v70_v3  ;;  %v1586_v6 = vld [vmem:[%s2161_s2 + $0x8] sm:$0xff]   ;;  %v1587_v7 = vld [vmem:[%s2161_s2 + $0x10] sm:$0xff]  }
   0xc   :  { %1407 = vmatpush3.bf16.msra.mxu1 %v1585_v5  ;;  %1426 = vmatprep.subr.bf16.mxu0 %v1659_v0  ;;  %v1588_v8 = vld [vmem:[%s2161_s2 + $0x18] sm:$0xff]   ;;  %v1589_v9 = vld [vmem:[%s2161_s2 + $0x20] sm:$0xff]   ;;  %v1590_v10 = vld [vmem:[%s2161_s2 + $0x28] sm:$0xff]  }
   0xd   :  { %1408 = vmatprep.subr.bf16.mxu1 %v1659_v0  ;;  %v1591_v11 = vld [vmem:[%s2161_s2 + $0x30] sm:$0xff]   ;;  %v1592_v12 = vld [vmem:[%s2161_s2 + $0x38] sm:$0xff]   ;;  %v1593_v13 = vld [vmem:[%s2162_s0] sm:$0xff]  }
   0xe   :  { %1403 = vmatmul.mubr.msk.bf16.vlgmr.msra.gmra.mrb[0].mxu0 %vm78_vm1, %v1781_v4  ;;  %v1594_v14 = vld [vmem:[%s2162_s0 + $0x8] sm:$0xff]   ;;  %v1595_v15 = vld [vmem:[%s2162_s0 + $0x10] sm:$0xff]   ;;  %v1596_v16 = vld [vmem:[%s2162_s0 + $0x18] sm:$0xff]  }
   0xf   :  { %1442 = vmatprep.mubr.msk.bf16.mxu0 %vm1660_vm0, %v1659_v0  ;;  %1427 = vmatpush3.bf16.msra.mxu0 %v1593_v13  ;;  %v1597_v17 = vld [vmem:[%s2162_s0 + $0x20] sm:$0xff]   ;;  %v1598_v18 = vld [vmem:[%s2162_s0 + $0x28] sm:$0xff]   ;;  %v1599_v28 = vld [vmem:[%s2162_s0 + $0x30] sm:$0xff]  }
  0x10   :  { %1409 = vmatpush3.bf16.msra.mxu1 %v1586_v6  ;;  %1428 = vmatprep.subr.bf16.mxu0 %v1659_v0  ;;  %v71_v19 = vld [vmem:[%s2163_s30] sm:$0xff]  ;;  %v72_v21 = vld [vmem:[%s2163_s30 + $0x8] sm:$0xff]  ;;  %v1600_v29 = vld [vmem:[%s2162_s0 + $0x38] sm:$0xff]  }
  0x11   :  { %1410 = vmatprep.subr.bf16.mxu1 %v1659_v0  ;;  %v1241_v13 = vld [vmem:[%s2137_s8] ss:$0 sm:$0xff] }
  0x13   :  { %1429 = vmatpush3.bf16.msra.mxu0 %v1594_v14 }
  0x14   :  { %1411 = vmatpush3.bf16.msra.mxu1 %v1587_v7  ;;  %1430 = vmatprep.subr.bf16.mxu0 %v1659_v0 }
  0x15   :  { %1412 = vmatprep.subr.bf16.mxu1 %v1659_v0 }
  0x17   :  { %1431 = vmatpush3.bf16.msra.mxu0 %v1595_v15 }
  0x18   :  { %1413 = vmatpush3.bf16.msra.mxu1 %v1588_v8  ;;  %1432 = vmatprep.subr.bf16.mxu0 %v1659_v0 }
  0x19   :  { %1414 = vmatprep.subr.bf16.mxu1 %v1659_v0 }
  0x1b   :  { %1433 = vmatpush3.bf16.msra.mxu0 %v1596_v16 }
  0x1c   :  { %1415 = vmatpush3.bf16.msra.mxu1 %v1589_v9  ;;  %1434 = vmatprep.subr.bf16.mxu0 %v1659_v0 }
  0x1d   :  { %1416 = vmatprep.subr.bf16.mxu1 %v1659_v0 }
  0x1f   :  { %1435 = vmatpush3.bf16.msra.mxu0 %v1597_v17 }
  0x20   :  { %1417 = vmatpush3.bf16.msra.mxu1 %v1590_v10  ;;  %1436 = vmatprep.subr.bf16.mxu0 %v1659_v0  ;;  %v1240_v10 = vld [vmem:[%s2136_s7] ss:$0 sm:$0xff] }
  0x21   :  { %1418 = vmatprep.subr.bf16.mxu1 %v1659_v0 }
  0x23   :  { %1437 = vmatpush3.bf16.msra.mxu0 %v1598_v18 }
  0x24   :  { %1419 = vmatpush3.bf16.msra.mxu1 %v1591_v11  ;;  %1438 = vmatprep.subr.bf16.mxu0 %v1659_v0 }
  0x25   :  { %1420 = vmatprep.subr.bf16.mxu1 %v1659_v0 }
  0x27   :  { %1439 = vmatpush3.bf16.msra.mxu0 %v1599_v28  ;;  %v1609_v28 = vld [vmem:[%s2162_s0 + $0x40] sm:$0xff]  }
  0x28   :  { %1421 = vmatpush3.bf16.msra.mxu1 %v1592_v12  ;;  %1440 = vmatprep.subr.bf16.mxu0 %v1659_v0 }
  0x29   :  { %1472 = vmatprep.subr.bf16.mxu1 %v1659_v0 }
  0x2b   :  { %1441 = vmatpush3.bf16.msra.mxu0 %v1600_v29  ;;  %v1610_v29 = vld [vmem:[%s2162_s0 + $0x48] sm:$0xff]  }
  0x2c   :  { %1446 = vmatprep.subr.bf16.mxu0 %v1659_v0 }
  0xe1   :  { %v116_v20 = vpop.f32.mrb[0].mxu0 }
  0xe2   :  { %v1404_v22 = vpop.f32.mrb[1].mxu0  ;;  %v117_v24 = vadd.f32 %v116_v20, %v71_v19 }
  0xe3   :  { %v119_v23 = vpop.f32.mrb[2].mxu0  ;;  %v1602_v22 = vld [vmem:[%s2161_s2 + $0x48] sm:$0xff]  }
  0xe4   :  { %v120_v25 = vadd.f32 %v119_v23, %v72_v21  ;;  %v1405_v26 = vpop.f32.mrb[3].mxu0  ;;  %v1601_v21 = vld [vmem:[%s2161_s2 + $0x40] sm:$0xff]   ;;  %v1603_v23 = vld [vmem:[%s2161_s2 + $0x50] sm:$0xff]  }
  0xe5   :  { %v1607_v26 = vld [vmem:[%s2161_s2 + $0x70] sm:$0xff]  }
  0xe6   :  { %v123_v27 = vpack.c.bf16 %v120_v25, %v117_v24  ;;  %v1605_v24 = vld [vmem:[%s2161_s2 + $0x60] sm:$0xff]   ;;  %v1606_v25 = vld [vmem:[%s2161_s2 + $0x68] sm:$0xff]  }
  0xe8   :  { %1423 = vmatmul.mubr.bf16.vlgmr.msra.gmra.mrb[0].mxu1 %v123_v27  ;;  %v1608_v27 = vld [vmem:[%s2161_s2 + $0x78] sm:$0xff]  }
  0xe9   :  { %1488 = vmatprep.mubr.msk.bf16.mxu1 %vm1660_vm0, %v1659_v0  ;;  %1473 = vmatpush3.bf16.msra.mxu1 %v1609_v28 }
  0xea   :  { %1474 = vmatprep.subr.bf16.mxu1 %v1659_v0 }
  0xed   :  { %1475 = vmatpush3.bf16.msra.mxu1 %v1610_v29 }
  0xee   :  { %1476 = vmatprep.subr.bf16.mxu1 %v1659_v0 }
 0x1bb   :  { %v229_v31 = vpop.f32.mrb[0].mxu1 }
 0x1bc   :  { %v230_v32 = vadd.f32 %v1222_v30, %v229_v31  ;;  %v1424_v33 = vpop.f32.mrb[1].mxu1  ;;  %v1612_v31 = vld [vmem:[%s2162_s0 + $0x58] sm:$0xff]  }
 0x1bd   :  { %v232_v34 = vpop.f32.mrb[2].mxu1  ;;  %v1614_v33 = vld [vmem:[%s2162_s0 + $0x68] sm:$0xff]  }
 0x1be   :  { %v233_v35 = vadd.f32 %v1222_v30, %v232_v34  ;;  %v1425_v36 = vpop.f32.mrb[3].mxu1  ;;  %v236_v37 = vmax.f32 %v230_v32, 0.0  ;;  %v1611_v30 = vld [vmem:[%s2162_s0 + $0x50] sm:$0xff]   ;;  %v1613_v32 = vld [vmem:[%s2162_s0 + $0x60] sm:$0xff]  }
 0x1bf   :  { %1477 = vmatpush3.bf16.msra.mxu1 %v1611_v30  ;;  %v1242_v34 = vld [vmem:[%s2163_s30 + $0x10] sm:$0xff]  ;;  %v1243_v36 = vld [vmem:[%s2163_s30 + $0x18] sm:$0xff] }
 0x1c0   :  { %v237_v38 = vmax.f32 %v233_v35, 0.0  ;;  %1478 = vmatprep.subr.bf16.mxu1 %v1659_v0 }
 0x1c2   :  { %v238_v39 = vpack.c.bf16 %v237_v38, %v236_v37 }
 0x1c3   :  { %1479 = vmatpush3.bf16.msra.mxu1 %v1612_v31 }
 0x1c4   :  { %1443 = vmatmul.mubr.bf16.vlgmr.msra.gmra.mrb[4].mxu0 %v238_v39  ;;  %1480 = vmatprep.subr.bf16.mxu1 %v1659_v0 }
 0x1c5   :  { %1448 = vmatprep.mubr.msk.bf16.mxu0 %vm1660_vm0, %v1659_v0 }
 0x1c7   :  { %1481 = vmatpush3.bf16.msra.mxu1 %v1613_v32 }
 0x1c8   :  { %1482 = vmatprep.subr.bf16.mxu1 %v1659_v0 }
 0x1cb   :  { %1483 = vmatpush3.bf16.msra.mxu1 %v1614_v33 }
 0x1cc   :  { %1484 = vmatprep.subr.bf16.mxu1 %v1659_v0 }
 0x297   :  { %v344_v41 = vpop.f32.mrb[4].mxu0 }
 0x298   :  { %v345_v42 = vadd.f32 %v1231_v40, %v344_v41  ;;  %v1444_v43 = vpop.f32.mrb[5].mxu0 }
 0x299   :  { %v347_v44 = vpop.f32.mrb[6].mxu0  ;;  %v1615_v43 = vld [vmem:[%s2162_s0 + $0x70] sm:$0xff]  }
 0x29a   :  { %v348_v45 = vadd.f32 %v1231_v40, %v347_v44  ;;  %v1445_v46 = vpop.f32.mrb[7].mxu0  ;;  %v351_v47 = vmul.f32 %v345_v42, %v345_v42  ;;  %1485 = vmatpush3.bf16.msra.mxu1 %v1615_v43  ;;  %v1616_v44 = vld [vmem:[%s2162_s0 + $0x78] sm:$0xff]   ;;  %v1300_v43 = vld [vmem:[%s2137_s8 + $0x1] ss:$0 sm:$0xff] }
 0x29b   :  { %1486 = vmatprep.subr.bf16.mxu1 %v1659_v0 }
 0x29c   :  { %v352_v48 = vmul.f32 %v348_v45, %v348_v45  ;;  %v353_v49 = vadd.f32 %v348_v45, %v345_v42 }
 0x29e   :  { %v354_v50 = vrot.slane %v353_v49, 4  ;;  %v360_v51 = vadd.f32 %v352_v48, %v351_v47  ;;  %1487 = vmatpush3.bf16.msra.mxu1 %v1616_v44 }
 0x2a0   :  { %v355_v52 = vadd.f32 %v354_v50, %v353_v49  ;;  %v361_v53 = vrot.slane %v360_v51, 4 }
 0x2a2   :  { %v356_v54 = vrot.slane %v355_v52, 2  ;;  %v362_v55 = vadd.f32 %v361_v53, %v360_v51 }
 0x2a4   :  { %v357_v56 = vadd.f32 %v356_v54, %v355_v52  ;;  %v363_v57 = vrot.slane %v362_v55, 2 }
 0x2a6   :  { %v358_v58 = vrot.slane %v357_v56, 1  ;;  %v364_v59 = vadd.f32 %v363_v57, %v362_v55  ;;  %v1617_v55 = vld [vmem:[%s2138_s11] ss:$8 sps:$4 sm:$0xff]   ;;  %v1622_v57 = vld [vmem:[%s2138_s11 + $0x14] ss:$8 sps:$4 sm:$0xff]  }
 0x2a8   :  { %v359_v60 = vadd.f32 %v358_v58, %v357_v56  ;;  %v365_v61 = vrot.slane %v364_v59, 1  ;;  %v1619_v56 = vld [vmem:[%s2138_s11 + $0x4] ss:$8 sps:$4 sm:$0xff]   ;;  %v1620_v58 = vld [vmem:[%s2138_s11 + $0x10] ss:$8 sps:$4 sm:$0xff]  }
 0x2a9   :  { %864 = vmatprep.subr.bf16.mxu1 %v1619_v56 }
 0x2aa   :  { %v366_v62 = vadd.f32 %v365_v61, %v364_v59  ;;  %v367_v63 = vmul.f32 0.0625, %v359_v60  ;;  %v1625_v59 = vld [vmem:[%s2138_s11 + $0x24] ss:$8 sps:$4 sm:$0xff]   ;;  %v1623_v60 = vld [vmem:[%s2138_s11 + $0x20] ss:$8 sps:$4 sm:$0xff]  }
 0x2ab   :  { %v1628_v61 = vld [vmem:[%s2138_s11 + $0x34] ss:$8 sps:$4 sm:$0xff]  }
 0x2ac   :  { %v368_v1 = vmul.f32 0.0625, %v366_v62  ;;  %v369_v2 = vmul.f32 %v367_v63, %v367_v63  ;;  %v372_v3 = vsub.f32 %v345_v42, %v367_v63  ;;  %v373_v5 = vsub.f32 %v348_v45, %v367_v63  ;;  %v1262_v45 = vld [vmem:[%s2134_s4 + $0x1] ss:$0 sm:$0xff]  ;;  %v1626_v62 = vld [vmem:[%s2138_s11 + $0x30] ss:$8 sps:$4 sm:$0xff]  }
 0x2ad   :  { %v1631_v63 = vld [vmem:[%s2138_s11 + $0x44] ss:$8 sps:$4 sm:$0xff]  }
 0x2ae   :  { %v370_v6 = vsub.f32 %v368_v1, %v369_v2  ;;  %v1629_v1 = vld [vmem:[%s2138_s11 + $0x40] ss:$8 sps:$4 sm:$0xff]   ;;  %v1634_v2 = vld [vmem:[%s2138_s11 + $0x54] ss:$8 sps:$4 sm:$0xff]  }
 0x2b0   :  { %v371_v7 = vmax.f32 %v370_v6, 0.0  ;;  %v1635_v6 = vld [vmem:[%s2138_s11 + $0x60] ss:$8 sps:$4 sm:$0xff]  }
 0x2b2   :  { %v374_v8 = vadd.f32 1e-05, %v371_v7  ;;  %v1640_v7 = vld [vmem:[%s2138_s11 + $0x74] ss:$8 sps:$4 sm:$0xff]  }
 0x2b4   :  { %1649 = vrsqrt.f32 %v374_v8  ;;  %v1638_v8 = vld [vmem:[%s2138_s11 + $0x70] ss:$8 sps:$4 sm:$0xff]  }
 0x2be   :  { %v1650_v9 = vpop.eup %1649 }
 0x2bf   :  { %v376_v11 = vmul.f32 %v1650_v9, %v372_v3  ;;  %v377_v12 = vmul.f32 %v1650_v9, %v373_v5  ;;  %v1632_v3 = vld [vmem:[%s2138_s11 + $0x50] ss:$8 sps:$4 sm:$0xff]   ;;  %v1637_v5 = vld [vmem:[%s2138_s11 + $0x64] ss:$8 sps:$4 sm:$0xff]   ;;  %v1288_v9 = vld [vmem:[%s2135_s6 + $0x1] ss:$0 sm:$0xff] }
 0x2c1   :  { %v385_v14 = vmul.f32 %v1240_v10, %v376_v11  ;;  %v386_v15 = vmul.f32 %v1240_v10, %v377_v12 }
 0x2c3   :  { %v394_v16 = vadd.f32 %v1241_v13, %v385_v14  ;;  %v395_v17 = vadd.f32 %v1241_v13, %v386_v15 }
 0x2c5   :  { %v396_v18 = vmax.f32 %v394_v16, 0.0  ;;  %v397_v19 = vmax.f32 %v395_v17, 0.0 }
 0x2c7   :  { %v398_v20 = vpack.c.bf16 %v397_v19, %v396_v18 }
 0x2c9   :  { %1447 = vmatpush3.bf16.msra.mxu0 %v398_v20 }
 0x2ca   :  { %1452 = vmatprep.subr.bf16.mxu0 %v1659_v0 }
 0x2cc   :  { %1449 = vmatmul.mubr.msk.bf16.vlgmr.msra.gmra.mrb[8].mxu0 %vm78_vm1, %v1781_v4  ;;  %v1604_v4 = vld [vmem:[%s2161_s2 + $0x58] sm:$0xff]  }
 0x2cd   :  { %1453 = vmatpush3.bf16.msra.mxu0 %v1601_v21  ;;  %1468 = vmatprep.mubr.msk.bf16.mxu0 %vm1660_vm0, %v1659_v0 }
 0x2ce   :  { %1454 = vmatprep.subr.bf16.mxu0 %v1659_v0 }
 0x2d1   :  { %1455 = vmatpush3.bf16.msra.mxu0 %v1602_v22 }
 0x2d2   :  { %1456 = vmatprep.subr.bf16.mxu0 %v1659_v0 }
 0x2d5   :  { %1457 = vmatpush3.bf16.msra.mxu0 %v1603_v23 }
 0x2d6   :  { %1458 = vmatprep.subr.bf16.mxu0 %v1659_v0 }
 0x2d9   :  { %1459 = vmatpush3.bf16.msra.mxu0 %v1604_v4 }
 0x2da   :  { %1460 = vmatprep.subr.bf16.mxu0 %v1659_v0 }
 0x2dd   :  { %1461 = vmatpush3.bf16.msra.mxu0 %v1605_v24 }
 0x2de   :  { %1462 = vmatprep.subr.bf16.mxu0 %v1659_v0 }
 0x2e1   :  { %1463 = vmatpush3.bf16.msra.mxu0 %v1606_v25 }
 0x2e2   :  { %1464 = vmatprep.subr.bf16.mxu0 %v1659_v0 }
 0x2e5   :  { %1465 = vmatpush3.bf16.msra.mxu0 %v1607_v26 }
 0x2e6   :  { %1466 = vmatprep.subr.bf16.mxu0 %v1659_v0 }
 0x2e9   :  { %1467 = vmatpush3.bf16.msra.mxu0 %v1608_v27 }
 0x2ea   :  { %1492 = vmatprep.subr.bf16.mxu0 %v1659_v0 }
 0x39f   :  { %v436_v35 = vpop.f32.mrb[8].mxu0 }
 0x3a0   :  { %v1450_v37 = vpop.f32.mrb[9].mxu0  ;;  %v437_v39 = vadd.f32 %v1242_v34, %v436_v35 }
 0x3a1   :  { %v439_v38 = vpop.f32.mrb[10].mxu0 }
 0x3a2   :  { %v440_v40 = vadd.f32 %v1243_v36, %v439_v38  ;;  %v1451_v41 = vpop.f32.mrb[11].mxu0 }
 0x3a4   :  { %v443_v42 = vpack.c.bf16 %v440_v40, %v437_v39  ;;  %v1298_v40 = vld [vmem:[%s2136_s7 + $0x1] ss:$0 sm:$0xff] }
 0x3a6   :  { %1469 = vmatmul.mubr.bf16.vlgmr.msra.gmra.mrb[12].mxu0 %v443_v42 }
 0x3a7   :  { %1494 = vmatprep.mubr.msk.bf16.mxu0 %vm1660_vm0, %v1659_v0 }
 0x479   :  { %v551_v46 = vpop.f32.mrb[12].mxu0 }
 0x47a   :  { %v552_v47 = vadd.f32 %v1262_v45, %v551_v46  ;;  %v1470_v48 = vpop.f32.mrb[13].mxu0 }
 0x47b   :  { %v554_v49 = vpop.f32.mrb[14].mxu0 }
 0x47c   :  { %v555_v50 = vadd.f32 %v1262_v45, %v554_v49  ;;  %v1471_v51 = vpop.f32.mrb[15].mxu0  ;;  %v558_v52 = vmax.f32 %v552_v47, 0.0  ;;  %v722_v49 = vld [vmem:[%s2139_s9] sm:$0x1] }
 0x47d   :  { %v905_v51 = vld [vmem:[%s2140_s10] sm:$0x3] }
 0x47e   :  { %v559_v53 = vmax.f32 %v555_v50, 0.0  ;;  %v1661_v50 = vmov 0  }
 0x47f   :  { %1582 = vset.pattern.permute.xlu1 %v1661_v50  ;;  %1583 = vset.pattern.permute.xlu0 %v1661_v50 }
 0x480   :  { %v560_v54 = vpack.c.bf16 %v559_v53, %v558_v52  ;;  %908 = vperm.xlu1 %1582, %v905_v51  }
 0x482   :  { %1489 = vmatmul.mubr.bf16.vlgmr.msra.gmra.mrb[4].mxu1 %v560_v54 }
 0x483   :  { %865 = vmatpush1.bf16.msra.mxu1 %v1617_v55  ;;  %896 = vmatprep.mubr.bf16.mxu1 %v1661_v50 }
 0x484   :  { %866 = vmatprep.subr.bf16.mxu1 %v1622_v57  ;;  %v1641_v57 = vld [vmem:[%s2141_s16] sm:$0xff]  }
 0x487   :  { %867 = vmatpush1.bf16.msra.mxu1 %v1620_v58  ;;  %v1642_v58 = vld [vmem:[%s2141_s16 + $0x8] sm:$0xff]  }
 0x488   :  { %868 = vmatprep.subr.bf16.mxu1 %v1625_v59  ;;  %v1643_v59 = vld [vmem:[%s2141_s16 + $0x10] sm:$0xff]  }
 0x48b   :  { %869 = vmatpush1.bf16.msra.mxu1 %v1623_v60  ;;  %v1644_v60 = vld [vmem:[%s2141_s16 + $0x18] sm:$0xff]  }
 0x48c   :  { %870 = vmatprep.subr.bf16.mxu1 %v1628_v61  ;;  %v1645_v61 = vld [vmem:[%s2141_s16 + $0x20] sm:$0xff]  }
 0x48f   :  { %871 = vmatpush1.bf16.msra.mxu1 %v1626_v62  ;;  %v1646_v62 = vld [vmem:[%s2141_s16 + $0x28] sm:$0xff]  }
 0x490   :  { %872 = vmatprep.subr.bf16.mxu1 %v1631_v63  ;;  %v1647_v63 = vld [vmem:[%s2141_s16 + $0x30] sm:$0xff]  }
 0x493   :  { %873 = vmatpush1.bf16.msra.mxu1 %v1629_v1  ;;  %v1648_v1 = vld [vmem:[%s2141_s16 + $0x38] sm:$0xff]  }
 0x494   :  { %874 = vmatprep.subr.bf16.mxu1 %v1634_v2  ;;  %v1662_v2 = vmov 0.0|0.0  }
 0x497   :  { %875 = vmatpush1.bf16.msra.mxu1 %v1632_v3  ;;  %v1082_v3 = vld [vmem:[%s2142_s18] sm:$0xff] }
 0x498   :  { %876 = vmatprep.subr.bf16.mxu1 %v1637_v5  ;;  %v1083_v5 = vld [vmem:[%s2142_s18 + $0x8] sm:$0xff] }
 0x49b   :  { %877 = vmatpush1.bf16.msra.mxu1 %v1635_v6  ;;  %v1084_v6 = vld [vmem:[%s2142_s18 + $0x10] sm:$0xff] }
 0x49c   :  { %878 = vmatprep.subr.bf16.mxu1 %v1640_v7  ;;  %v1554_v7 = vpack.c.bf16 %v1083_v5, %v1082_v3 }
 0x49f   :  { %879 = vmatpush1.bf16.msra.mxu1 %v1638_v8 }
 0x4a0   :  { %1553 = vmatprep.subr.bf16.mxu1 %v1662_v2 }
 0x555   :  { %v668_v10 = vpop.f32.mrb[4].mxu1 }
 0x556   :  { %v669_v11 = vadd.f32 %v1288_v9, %v668_v10  ;;  %v1490_v12 = vpop.f32.mrb[5].mxu1  ;;  %v1087_v10 = vld [vmem:[%s2142_s18 + $0x28] sm:$0xff] }
 0x557   :  { %v671_v13 = vpop.f32.mrb[6].mxu1  ;;  %v1088_v12 = vld [vmem:[%s2142_s18 + $0x30] sm:$0xff] }
 0x558   :  { %v672_v14 = vadd.f32 %v1288_v9, %v671_v13  ;;  %v1491_v15 = vpop.f32.mrb[7].mxu1  ;;  %v675_v16 = vmul.f32 %v669_v11, %v669_v11  ;;  %v1086_v9 = vld [vmem:[%s2142_s18 + $0x20] sm:$0xff]  ;;  %v1089_v13 = vld [vmem:[%s2142_s18 + $0x38] sm:$0xff] }
 0x559   :  { %v1090_v15 = vld [vmem:[%s2142_s18 + $0x40] sm:$0xff] }
 0x55a   :  { %v676_v17 = vmul.f32 %v672_v14, %v672_v14  ;;  %v677_v18 = vadd.f32 %v672_v14, %v669_v11 }
 0x55c   :  { %v678_v19 = vrot.slane %v677_v18, 4  ;;  %v684_v20 = vadd.f32 %v676_v17, %v675_v16  ;;  %v1091_v16 = vld [vmem:[%s2142_s18 + $0x48] sm:$0xff] }
 0x55d   :  { %v1566_v17 = vpack.c.bf16 %v1091_v16, %v1090_v15 }
 0x55e   :  { %v679_v21 = vadd.f32 %v678_v19, %v677_v18  ;;  %v685_v22 = vrot.slane %v684_v20, 4  ;;  %v1092_v18 = vld [vmem:[%s2142_s18 + $0x50] sm:$0xff]  ;;  %v1093_v19 = vld [vmem:[%s2142_s18 + $0x58] sm:$0xff] }
 0x560   :  { %v680_v23 = vrot.slane %v679_v21, 2  ;;  %v686_v4 = vadd.f32 %v685_v22, %v684_v20  ;;  %v1569_v20 = vpack.c.bf16 %v1093_v19, %v1092_v18  ;;  %v1095_v22 = vld [vmem:[%s2142_s18 + $0x68] sm:$0xff] }
 0x562   :  { %v681_v24 = vadd.f32 %v680_v23, %v679_v21  ;;  %v687_v25 = vrot.slane %v686_v4, 2  ;;  %v1094_v21 = vld [vmem:[%s2142_s18 + $0x60] sm:$0xff] }
 0x563   :  { %v1572_v23 = vpack.c.bf16 %v1095_v22, %v1094_v21  ;;  %v1186_v21 = vlaneseq }
 0x564   :  { %v682_v26 = vrot.slane %v681_v24, 1  ;;  %v688_v27 = vadd.f32 %v687_v25, %v686_v4  ;;  %v1319_v4 = vld [vmem:[%s2143_s13] ss:$0 sm:$0xff] }
 0x565   :  { %v1187_v22 = vand.u32 127, %v1186_v21 }
 0x566   :  { %v683_v28 = vadd.f32 %v682_v26, %v681_v24  ;;  %v689_v29 = vrot.slane %v688_v27, 1 }
 0x567   :  { %vm1188_vm3 = vcmp.lt.s32.totalorder %v1187_v22, 3 }
 0x568   :  { %v690_v30 = vadd.f32 %v689_v29, %v688_v27  ;;  %v691_v31 = vmul.f32 0.0625, %v683_v28 }
 0x56a   :  { %v692_v32 = vmul.f32 0.0625, %v690_v30  ;;  %v693_v33 = vmul.f32 %v691_v31, %v691_v31  ;;  %v696_v34 = vsub.f32 %v669_v11, %v691_v31  ;;  %v697_v35 = vsub.f32 %v672_v14, %v691_v31 }
 0x56b   :  { %v1560_v11 = vpack.c.bf16 %v1087_v10, %v1086_v9  ;;  %v1563_v14 = vpack.c.bf16 %v1089_v13, %v1088_v12  ;;  %v1331_v12 = vld [vmem:[%s2148_s19] ss:$0 sm:$0xff] }
 0x56c   :  { %v694_v36 = vsub.f32 %v692_v32, %v693_v33 }
 0x56e   :  { %v695_v37 = vmax.f32 %v694_v36, 0.0 }
 0x570   :  { %v698_v38 = vadd.f32 1e-05, %v695_v37 }
 0x572   :  { %1651 = vrsqrt.f32 %v698_v38 }
 0x57c   :  { %v1652_v39 = vpop.eup %1651 }
 0x57d   :  { %v700_v41 = vmul.f32 %v1652_v39, %v696_v34  ;;  %v701_v42 = vmul.f32 %v1652_v39, %v697_v35 }
 0x57f   :  { %v710_v44 = vmul.f32 %v1298_v40, %v700_v41  ;;  %v711_v45 = vmul.f32 %v1298_v40, %v701_v42 }
 0x581   :  { %v720_v46 = vadd.f32 %v1300_v43, %v710_v44  ;;  %v721_v47 = vadd.f32 %v1300_v43, %v711_v45 }
 0x583   :  { %v723_v48 = vpack.c.bf16 %v721_v47, %v720_v46 }
 0x585   :  { %1493 = vmatpush3.bf16.msra.mxu0 %v723_v48 }
 0x586   :  { %1498 = vmatprep.subr.bf16.mxu0 %v1659_v0 }
 0x588   :  { %1495 = vmatmul.mubr.msk.bf16.vlgmr.msra.gmra.mrb[16].mxu0 %vm78_vm1, %v722_v49 }
 0x589   :  { %1514 = vmatprep.mubr.msk.bf16.mxu0 %vm1660_vm0, %v1659_v0  ;;  %1499 = vmatpush3.bf16.msra.mxu0 %v1641_v57 }
 0x58a   :  { %1500 = vmatprep.subr.bf16.mxu0 %v1659_v0 }
 0x58d   :  { %1501 = vmatpush3.bf16.msra.mxu0 %v1642_v58 }
 0x58e   :  { %1502 = vmatprep.subr.bf16.mxu0 %v1659_v0 }
 0x591   :  { %1503 = vmatpush3.bf16.msra.mxu0 %v1643_v59  ;;  %v1096_v59 = vld [vmem:[%s2142_s18 + $0x70] sm:$0xff] }
 0x592   :  { %1504 = vmatprep.subr.bf16.mxu0 %v1659_v0 }
 0x595   :  { %1505 = vmatpush3.bf16.msra.mxu0 %v1644_v60  ;;  %v1097_v60 = vld [vmem:[%s2142_s18 + $0x78] sm:$0xff] }
 0x596   :  { %1506 = vmatprep.subr.bf16.mxu0 %v1659_v0 }
 0x599   :  { %1507 = vmatpush3.bf16.msra.mxu0 %v1645_v61  ;;  %v1575_v61 = vpack.c.bf16 %v1097_v60, %v1096_v59 }
 0x59a   :  { %1508 = vmatprep.subr.bf16.mxu0 %v1659_v0 }
 0x59d   :  { %1509 = vmatpush3.bf16.msra.mxu0 %v1646_v62  ;;  %v909_v62 = vpop.permute.xlu1 %908 }
 0x59e   :  { %1510 = vmatprep.subr.bf16.mxu0 %v1659_v0 }
 0x5a1   :  { %1511 = vmatpush3.bf16.msra.mxu0 %v1647_v63 }
 0x5a2   :  { %1512 = vmatprep.subr.bf16.mxu0 %v1659_v0 }
 0x5a5   :  { %1513 = vmatpush3.bf16.msra.mxu0 %v1648_v1  ;;  %v1318_v1 = vld [vmem:[%s2146_s12] ss:$0 sm:$0xff] }
 0x65b   :  { %v761_v52 = vpop.f32.mrb[16].mxu0 }
 0x65c   :  { %v767_v53 = vpack.c.bf16 %v761_v52, %v761_v52  ;;  %v1496_v54 = vpop.f32.mrb[17].mxu0  ;;  %v1320_v52 = vld [vmem:[%s2144_s14] ss:$0 sm:$0xff] }
 0x65d   :  { %v764_v55 = vpop.f32.mrb[18].mxu0  ;;  %v1321_v54 = vld [vmem:[%s2145_s15] ss:$0 sm:$0xff] }
 0x65e   :  { %897 = vmatmul.mubr.bf16.vlgmr.msra.gmra.mrb[8].mxu1 %v767_v53  ;;  %v1497_v56 = vpop.f32.mrb[19].mxu0 }
 0x65f   :  { %1550 = vmatprep.mubr.msk.f32.mxu1 %vm1660_vm0, %v1659_v0  ;;  %v1085_v0 = vld [vmem:[%s2142_s18 + $0x18] sm:$0xff]  ;;  %1555 = vmatpush3.bf16.msra.mxu1 %v1554_v7 }
 0x660   :  { %v1557_v8 = vpack.c.bf16 %v1085_v0, %v1084_v6  ;;  %1556 = vmatprep.subr.bf16.mxu1 %v1662_v2 }
 0x663   :  { %1558 = vmatpush3.bf16.msra.mxu1 %v1557_v8 }
 0x664   :  { %1559 = vmatprep.subr.bf16.mxu1 %v1662_v2 }
 0x667   :  { %1561 = vmatpush3.bf16.msra.mxu1 %v1560_v11 }
 0x668   :  { %1562 = vmatprep.subr.bf16.mxu1 %v1662_v2 }
 0x66b   :  { %1564 = vmatpush3.bf16.msra.mxu1 %v1563_v14 }
 0x66c   :  { %1565 = vmatprep.subr.bf16.mxu1 %v1662_v2 }
 0x66f   :  { %1567 = vmatpush3.bf16.msra.mxu1 %v1566_v17 }
 0x670   :  { %1568 = vmatprep.subr.bf16.mxu1 %v1662_v2 }
 0x673   :  { %1570 = vmatpush3.bf16.msra.mxu1 %v1569_v20 }
 0x674   :  { %1571 = vmatprep.subr.bf16.mxu1 %v1662_v2 }
 0x677   :  { %1573 = vmatpush3.bf16.msra.mxu1 %v1572_v23 }
 0x678   :  { %1574 = vmatprep.subr.bf16.mxu1 %v1662_v2  ;;  %v1322_v2 = vld [vmem:[%s2147_s17] ss:$0 sm:$0xff] }
 0x67b   :  { %1576 = vmatpush3.bf16.msra.mxu1 %v1575_v61 }
 0x731   :  { %v898_v24 = vpop.f32.mrb[8].mxu1 }
 0x732   :  { %v900_v25 = vpop.f32.mrb[9].mxu1  ;;  %v911_v63 = vmul.f32 %v909_v62, %v898_v24 }
 0x733   :  { %v927_v26 = vadd.f32 %v1319_v4, %v900_v25  ;;  %v902_v27 = vpop.f32.mrb[10].mxu1 }
 0x734   :  { %v903_v28 = vpop.f32.mrb[11].mxu1  ;;  %v919_v5 = vadd.f32 %v1318_v1, %v911_v63 }
 0x735   :  { %v928_v29 = vmul.f32 %v927_v26, %v927_v26  ;;  %v930_v30 = vsel %vm929_vm2, %v927_v26, 0.0 }
 0x736   :  { %v931_v31 = vrot.slane %v930_v30, 4 }
 0x737   :  { %v937_v32 = vsel %vm929_vm2, %v928_v29, 0.0  ;;  %v1203_v29 = vshrl.u32 %v1186_v21, 7 }
 0x738   :  { %v932_v33 = vadd.f32 %v931_v31, %v930_v30  ;;  %v938_v34 = vrot.slane %v937_v32, 4 }
 0x73a   :  { %v933_v35 = vrot.slane %v932_v33, 2  ;;  %v939_v36 = vadd.f32 %v938_v34, %v937_v32 }
 0x73c   :  { %v934_v37 = vadd.f32 %v933_v35, %v932_v33  ;;  %v940_v38 = vrot.slane %v939_v36, 2 }
 0x73e   :  { %v935_v39 = vrot.slane %v934_v37, 1  ;;  %v941_v40 = vadd.f32 %v940_v38, %v939_v36 }
 0x740   :  { %v936_v41 = vadd.f32 %v935_v39, %v934_v37  ;;  %v942_v42 = vrot.slane %v941_v40, 1 }
 0x742   :  { %v943_v43 = vadd.f32 %v942_v42, %v941_v40  ;;  %v944_v44 = vmul.f32 0.5, %v936_v41 }
 0x744   :  { %v945_v45 = vmul.f32 0.5, %v943_v43  ;;  %v946_v46 = vmul.f32 %v944_v44, %v944_v44  ;;  %v949_v50 = vsub.f32 %v927_v26, %v944_v44  ;;  %v1663_v26 = vmov 1983009808  }
 0x745   :  { %v1200_v27 = vunpack.c.l.s4 %v1663_v26 }
 0x746   :  { %v947_v47 = vsub.f32 %v945_v45, %v946_v46 }
 0x747   :  { %v1201_v28 = vunpack.c.0.s8 %v1200_v27 }
 0x748   :  { %v948_v48 = vmax.f32 %v947_v47, 0.0 }
 0x749   :  { %v1204_v30 = vsub.s32 %v1201_v28, %v1203_v29 }
 0x74a   :  { %v950_v49 = vadd.f32 1e-05, %v948_v48 }
 0x74c   :  { %1653 = vrsqrt.f32 %v950_v49 }
 0x756   :  { %v1654_v51 = vpop.eup %1653 }
 0x757   :  { %v952_v53 = vmul.f32 %v1654_v51, %v949_v50 }
 0x759   :  { %v960_v55 = vmul.f32 %v1320_v52, %v952_v53 }
 0x75b   :  { %v968_v56 = vadd.f32 %v1321_v54, %v960_v55 }
 0x75d   :  { %v969_v57 = vmax.f32 %v968_v56, 0.0 }
 0x75f   :  { %v970_v58 = vpack.c.bf16 %v969_v57, %v969_v57 }
 0x761   :  { %1515 = vmatmul.mubr.bf16.vlgmr.msra.gmra.mrb[20].mxu0 %v970_v58 }
 0x834   :  { %v1076_v3 = vpop.f32.mrb[20].mxu0 }
 0x835   :  { %v1077_v6 = vadd.f32 %v1322_v2, %v1076_v3  ;;  %v1516_v7 = vpop.f32.mrb[21].mxu0 }
 0x836   :  { %v1079_v0 = vpop.f32.mrb[22].mxu0 }
 0x837   :  { %v1198_v8 = vcombine.low %v919_v5, %v1077_v6  ;;  %v1517_v9 = vpop.f32.mrb[23].mxu0  ;;  %1551 = vmatmul.mubr.f32.vlgmr.msra.gmra.mrb[12].mxu1 %v1077_v6  ;;  %v1098_v10 = vmul.f32 %v1077_v6, %v1077_v6 }
 0x839   :  { %v1099_v11 = vsel %vm929_vm2, %v1098_v10, 0.0  ;;  %v1205_v33 = vrot.slane %v1198_v8, %v1204_v30 }
 0x83a   :  { %1100 = vadd.xlane.f32.xlu0 %v1099_v11 }
 0x8c7   :  { %v1101_v13 = vpop.xlane.xlu0 %1100 }
 0x8c8   :  { %v1109_v15 = vadd.f32 %v1331_v12, %v1101_v13 }
 0x90a   :  { %v1176_v14 = vpop.f32.mrb[12].mxu1 }
 0x90b   :  { %v1180_v16 = vmul.f32 2.0, %v1176_v14  ;;  %v1552_v17 = vpop.f32.mrb[13].mxu1 }
 0x90d   :  { %v1181_v18 = vsub.f32 %v1109_v15, %v1180_v16 }
 0x90f   :  { %v1182_v19 = vmax.f32 %v1181_v18, 0.0 }
 0x911   :  { %v1183_v20 = vadd.f32 1.0, %v1182_v19 }
 0x913   :  { %1655 = vrcp.f32 %v1183_v20 }
 0x91d   :  { %v1656_v23 = vpop.eup %1655 }
 0x91e   :  { %v1189_v4 = vsel %vm1188_vm3, %v1656_v23, 0.0 }
 0x91f   :  { %v1190_v24 = vsel %vm929_vm2, %v1189_v4, 0.0 }
 0x920   :  { %1191 = vadd.xlane.f32.xlu0 %v1190_v24 }
 0x9ad   :  { %v1192_v25 = vpop.xlane.xlu0 %1191 }
 0x9ae   :  { %1657 = vrcp.f32 %v1192_v25 }
 0x9b8   :  { %v1658_v31 = vpop.eup %1657 }
 0x9b9   :  { %v1194_v32 = vmul.f32 %v1658_v31, %v1189_v4 }
 0x9bb   :  { %v1212_v34 = vrot.slane %v1194_v32, %v1204_v30 }
 0x9bd   :  { %v1213_v35 = vcombine.low %v1205_v33, %v1212_v34 }
 0x9bf   :  { %1215 = vst [vmem:[%s2149_s20] sm:$0x3f] %v1213_v35 }

</bundles_post_ra>
